<compile_context>
chip_gen: v7x
topology: tpu7x:2x2x1
jax: 0.10.0
libtpu: 0.0.40
codegen_flags: <defaults>
</compile_context>

<pallas_src>
import jax
import jax.numpy as jnp
from jax.experimental import pallas as pl
from jax.experimental.pallas import tpu as pltpu

# LayerNorm eps — VAR builds norm_layer = partial(nn.LayerNorm, eps=1e-6).
LN_EPS = 1e-6

_TARGET_BLOCK_BYTES = 4 << 20   # ~4 MiB of x per grid step
_MIN_SPLIT_BYTES = 1 << 20      # below this total, a single grid step is fine


def _ln_modulate_kernel(ada_ref, x_ref, out_ref):
    # ada_ref: (TB, 2, C)  — row 0 = scale, row 1 = shift (per batch row)
    # x_ref / out_ref: (TB, TL, C)
    x = x_ref[...].astype(jnp.float32)

    # LayerNorm over C (no affine), biased variance as in nn.LayerNorm.
    mean = jnp.mean(x, axis=-1, keepdims=True)
    xc = x - mean
    var = jnp.mean(xc * xc, axis=-1, keepdims=True)
    ln = xc * jax.lax.rsqrt(var + LN_EPS)          # rsqrt -> EUP slot

    ada = ada_ref[...].astype(jnp.float32)
    scale = ada[:, 0:1, :]                         # (TB, 1, C) broadcast over TL
    shift = ada[:, 1:2, :]
    out_ref[...] = (ln * (scale + 1.0) + shift).astype(out_ref.dtype)


def _largest_mult8_divisor(n, cap):
    """Largest divisor of n that is a multiple of 8 and <= cap (0 if none)."""
    if n % 8 != 0 or cap < 8:
        return 0
    best = 0
    i = 1
    while i * i <= n:
        if n % i == 0:
            for d in (i, n // i):
                if d % 8 == 0 and d <= cap and d > best:
                    best = d
        i += 1
    return best


def _choose_tiles(B, L, C, itemsize):
    row_bytes = C * itemsize                 # one token
    batch_row_bytes = L * row_bytes          # one full batch row
    total_bytes = B * batch_row_bytes

    if batch_row_bytes <= _TARGET_BLOCK_BYTES:
        # Regime A: whole L per block; pack batch rows up to the byte target.
        TL = L
        TB = max(1, min(B, _TARGET_BLOCK_BYTES // max(1, batch_row_bytes)))
    else:
        # Regime B: one batch row per block; tile tokens.
        TB = 1
        cap = max(8, (_TARGET_BLOCK_BYTES // row_bytes) // 8 * 8)
        TL = _largest_mult8_divisor(L, cap)  # avoid ragged last tile if possible
        if TL == 0:
            TL = min(cap, max(8, (L // 8) * 8)) if L >= 8 else L

    # Never collapse non-trivial work to a single grid step (v7x has 2 TCs that
    # only get used when a parallel axis has >= 2 steps).
    if pl.cdiv(B, TB) * pl.cdiv(L, TL) == 1 and total_bytes > _MIN_SPLIT_BYTES:
        if B >= 2:
            TB = pl.cdiv(B, 2)
        else:
            half = _largest_mult8_divisor(L, max(8, L // 2))
            if half == 0 and L >= 16:
                half = max(8, ((L // 2) // 8) * 8)
            if half:
                TL = half
    return TB, TL


def adaln_before_head(x_BLC, cond_BD, w_out_in, bias_out, *, donate_x=False):
    """x_BLC: (B, L, C); cond_BD: (B, D);
    w_out_in: (2C, D) PyTorch-style Linear weight; bias_out: (2C,)."""
    B, L, C = x_BLC.shape
    D = cond_BD.shape[-1]
    assert w_out_in.shape == (2 * C, D)
    assert bias_out.shape == (2 * C,)

    # ---- ada_lin hoisted out of the kernel: SiLU(cond) @ W^T + b -------------
    cond_f32 = cond_BD.astype(jnp.float32)
    silu = cond_f32 * jax.nn.sigmoid(cond_f32)
    ada = jax.lax.dot_general(
        silu.astype(w_out_in.dtype), w_out_in,
        dimension_numbers=(((1,), (1,)), ((), ())),
        preferred_element_type=jnp.float32,
        precision=jax.lax.Precision.HIGHEST,
    ) + bias_out.astype(jnp.float32)                 # (B, 2C)
    ada = ada.reshape(B, 2, C)                       # [:,0,:]=scale, [:,1,:]=shift

    # ---- tiling & VMEM budget ------------------------------------------------
    itemsize = jnp.dtype(x_BLC.dtype).itemsize
    TB, TL = _choose_tiles(B, L, C, itemsize)

    block_x_bytes = TB * TL * C * itemsize
    block_ada_bytes = TB * 2 * C * 4
    per_step = 2 * block_x_bytes + block_ada_bytes   # x in + out + ada
    vmem_limit = int(2 * per_step * 1.25) + (1 << 20)  # double-buffer + slack
    vmem_limit = max(8 << 20, min(vmem_limit, 48 << 20))

    grid = (pl.cdiv(B, TB), pl.cdiv(L, TL))

    return pl.pallas_call(
        _ln_modulate_kernel,
        out_shape=jax.ShapeDtypeStruct((B, L, C), x_BLC.dtype),
        grid_spec=pltpu.PrefetchScalarGridSpec(
            num_scalar_prefetch=0,
            grid=grid,
            in_specs=[
                pl.BlockSpec((TB, 2, C), lambda b, l: (b, 0, 0)),    # ada (scale/shift)
                pl.BlockSpec((TB, TL, C), lambda b, l: (b, l, 0)),   # x
            ],
            out_specs=pl.BlockSpec((TB, TL, C), lambda b, l: (b, l, 0)),
        ),
        compiler_params=pltpu.CompilerParams(
            dimension_semantics=("parallel", "parallel"),
            vmem_limit_bytes=vmem_limit,
        ),
        # Only alias x -> out when the caller guarantees x is dead afterwards
        # (true in VAR's head path); saves an HBM output allocation.
        input_output_aliases=({1: 0} if donate_x else {}),
    )(ada, x_BLC)


def _reference(x_BLC, cond_BD, w_out_in, bias_out):
    """Pure-JAX reference mirroring the PyTorch forward."""
    B, L, C = x_BLC.shape
    silu = cond_BD * jax.nn.sigmoid(cond_BD)
    ada = jnp.matmul(silu, w_out_in.T,
                     precision=jax.lax.Precision.HIGHEST) + bias_out   # (B, 2C)
    scale = ada[:, :C][:, None, :]
    shift = ada[:, C:][:, None, :]
    mean = jnp.mean(x_BLC, axis=-1, keepdims=True)
    var = jnp.mean((x_BLC - mean) ** 2, axis=-1, keepdims=True)
    ln = (x_BLC - mean) / jnp.sqrt(var + LN_EPS)
    return ln * (scale + 1.0) + shift


if __name__ == "__main__":
    key = jax.random.PRNGKey(0)

    def run_case(B, L, C, D, k):
        kx, kc, kw, kb = jax.random.split(k, 4)
        x_BLC = jax.random.normal(kx, (B, L, C), dtype=jnp.float32)
        cond_BD = jax.random.normal(kc, (B, D), dtype=jnp.float32)
        w = jax.random.normal(kw, (2 * C, D), dtype=jnp.float32) * 0.05
        b = jax.random.normal(kb, (2 * C,), dtype=jnp.float32) * 0.05

        out = jax.block_until_ready(adaln_before_head(x_BLC, cond_BD, w, b))
        ref = _reference(x_BLC, cond_BD, w, b)
        assert out.shape == (B, L, C)
        assert jnp.allclose(out, ref, atol=2e-5, rtol=2e-5), \
            f"mismatch vs reference for shape {(B, L, C, D)}"

    k1, k2 = jax.random.split(key)
    # Small shape consistent with the module (toy config).
    run_case(B=2, L=8, C=32, D=32, k=k1)
    # Mid-size shape exercising batch packing + the grid-never-(1,1) split.
    run_case(B=4, L=272, C=256, D=128, k=k2)

    print("KERNEL_OK")
</pallas_src>

<mosaic_0001>
module attributes {stable_mosaic.version = 11 : i64} {
  func.func @_ln_modulate_kernel(%arg0: i32, %arg1: i32, %arg2: memref<2x2x32xf32, #tpu.memory_space<vmem>>, %arg3: memref<2x8x32xf32, #tpu.memory_space<vmem>>, %arg4: memref<2x8x32xf32, #tpu.memory_space<vmem>>) attributes {dimension_semantics = [#tpu.dimension_semantics<parallel>, #tpu.dimension_semantics<parallel>], iteration_bounds = array<i64: 1, 1>, scalar_prefetch = 0 : i64, scratch_operands = 0 : i64, tpu.core_type = #tpu.core_type<tc>, window_params = [{transform_indices = @transform_0, window_bounds = array<i64: 2, 2, 32>}, {transform_indices = @transform_1, window_bounds = array<i64: 2, 8, 32>}, {transform_indices = @transform_2, window_bounds = array<i64: 2, 8, 32>}]} {
    %c0 = arith.constant 0 : index
    %c0_0 = arith.constant 0 : index
    %c0_1 = arith.constant 0 : index
    %0 = vector.load %arg3[%c0, %c0_0, %c0_1] : memref<2x8x32xf32, #tpu.memory_space<vmem>>, vector<2x8x32xf32>
    %cst = arith.constant dense<0.000000e+00> : vector<2x8xf32>
    %1 = vector.multi_reduction <add>, %0, %cst [2] : vector<2x8x32xf32> to vector<2x8xf32>
    %2 = vector.shape_cast %1 : vector<2x8xf32> to vector<2x8x1xf32>
    %cst_2 = arith.constant 3.200000e+01 : f32
    %3 = vector.broadcast %cst_2 : f32 to vector<2x8x1xf32>
    %4 = arith.divf %2, %3 : vector<2x8x1xf32>
    %5 = vector.broadcast %4 : vector<2x8x1xf32> to vector<2x8x32xf32>
    %6 = arith.subf %0, %5 : vector<2x8x32xf32>
    %7 = arith.mulf %6, %6 : vector<2x8x32xf32>
    %cst_3 = arith.constant dense<0.000000e+00> : vector<2x8xf32>
    %8 = vector.multi_reduction <add>, %7, %cst_3 [2] : vector<2x8x32xf32> to vector<2x8xf32>
    %9 = vector.shape_cast %8 : vector<2x8xf32> to vector<2x8x1xf32>
    %cst_4 = arith.constant 3.200000e+01 : f32
    %10 = vector.broadcast %cst_4 : f32 to vector<2x8x1xf32>
    %11 = arith.divf %9, %10 : vector<2x8x1xf32>
    %cst_5 = arith.constant 9.99999997E-7 : f32
    %12 = vector.broadcast %cst_5 : f32 to vector<2x8x1xf32>
    %13 = arith.addf %11, %12 : vector<2x8x1xf32>
    %14 = math.rsqrt %13 : vector<2x8x1xf32>
    %15 = vector.broadcast %14 : vector<2x8x1xf32> to vector<2x8x32xf32>
    %16 = arith.mulf %6, %15 : vector<2x8x32xf32>
    %c0_6 = arith.constant 0 : index
    %c0_7 = arith.constant 0 : index
    %c0_8 = arith.constant 0 : index
    %17 = vector.load %arg2[%c0_6, %c0_7, %c0_8] : memref<2x2x32xf32, #tpu.memory_space<vmem>>, vector<2x2x32xf32>
    %18 = vector.extract_strided_slice %17 {offsets = [0, 0, 0], sizes = [2, 1, 32], strides = [1, 1, 1]} : vector<2x2x32xf32> to vector<2x1x32xf32>
    %19 = vector.extract_strided_slice %17 {offsets = [0, 1, 0], sizes = [2, 1, 32], strides = [1, 1, 1]} : vector<2x2x32xf32> to vector<2x1x32xf32>
    %cst_9 = arith.constant 1.000000e+00 : f32
    %20 = vector.broadcast %cst_9 : f32 to vector<2x1x32xf32>
    %21 = arith.addf %18, %20 : vector<2x1x32xf32>
    %22 = vector.broadcast %21 : vector<2x1x32xf32> to vector<2x8x32xf32>
    %23 = arith.mulf %16, %22 : vector<2x8x32xf32>
    %24 = vector.broadcast %19 : vector<2x1x32xf32> to vector<2x8x32xf32>
    %25 = arith.addf %23, %24 : vector<2x8x32xf32>
    %c0_10 = arith.constant 0 : index
    %c0_11 = arith.constant 0 : index
    %c0_12 = arith.constant 0 : index
    %26 = vector.load %arg4[%c0_10, %c0_11, %c0_12] : memref<2x8x32xf32, #tpu.memory_space<vmem>>, vector<2x8x32xf32>
    tpu.vector_store %arg4[%c0_10, %c0_11, %c0_12], %25 {strides = array<i32>} : memref<2x8x32xf32, #tpu.memory_space<vmem>>, vector<2x8x32xf32>,
    return
  }
  func.func @transform_0(%arg0: i32, %arg1: i32) -> (i32, i32, i32) {
    %c0_i32 = arith.constant 0 : i32
    %c0_i32_0 = arith.constant 0 : i32
    %c0_i32_1 = arith.constant 0 : i32
    return %arg0, %c0_i32, %c0_i32_0 : i32, i32, i32
  }
  func.func @transform_1(%arg0: i32, %arg1: i32) -> (i32, i32, i32) {
    %c0_i32 = arith.constant 0 : i32
    %c0_i32_0 = arith.constant 0 : i32
    return %arg0, %arg1, %c0_i32 : i32, i32, i32
  }
  func.func @transform_2(%arg0: i32, %arg1: i32) -> (i32, i32, i32) {
    %c0_i32 = arith.constant 0 : i32
    %c0_i32_0 = arith.constant 0 : i32
    return %arg0, %arg1, %c0_i32 : i32, i32, i32
  }
}

</mosaic_0001>

<bundles_post_ra>
// kernel: tpu_custom_call.1
= control target key start
LH: loop header
LB: loop body
LE: loop exit
PB: predicated region body
PF: predicated region fallthrough
CT: control target
= control target key end

     0   :  { %7 = vsyncpa [#allocation3], 0  ;;  %s267_s0 = inlined_call_operand.hbm [shape: f32[2,2,32], index: 0, kind: input, shape index: {}]   ;;  %s268_s1 = inlined_call_operand.hbm [shape: f32[2,8,32], index: 1, kind: input, shape index: {}]   ;;  %s269_s2 = inlined_call_operand.hbm [shape: f32[2,8,32], index: 2, kind: output, shape index: {}]  }
   0x1   :  { %8 = vsyncpa [#allocation6], 0 }
   0x2   :  { %9 = vsyncpa [#allocation4], 0  ;;  %s197_s9 = smov [#allocation2]   ;;  %s125_s13 = scalar_lea.hbm %s267_s0, 64 }
   0x3   :  { %s15_s10 = sshll.u32 %s197_s9, 4  ;;  %p126_p0 = scmp.ne.s32.totalorder %s267_s0, %s125_s13  ;;  %s16_s10 = int_to_ptr.vmem [resolvable:$true] %s15_s10 }
   0x4   :  { %p129_p1 = scmp.lt.u32.totalorder %s125_s13, %s267_s0 }
   0x6   :  { %p131_p2 = pnand %p129_p1, %p126_p0 }
   0x8   :  { %134 = shalt.err (!%p131_p2)
}
   0x9   :  { %s135_s18 = scalar_lea.vmem %s16_s10, 64  ;;  %p140_p4 = scmp.lt.s32.totalorder %s16_s10, %s16_s10 }
   0xa   :  { %p136_p3 = scmp.ne.s32.totalorder %s16_s10, %s135_s18  ;;  %p141_p5 = scmp.lt.s32.totalorder %s135_s18, %s135_s18 }
   0xc   :  { %p142_p6 = por %p141_p5, %p140_p4 }
   0xe   :  { %p143_p7 = pnand %p142_p6, %p136_p3 }
  0x10   :  { %146 = shalt.err (!%p143_p7)
}
  0x11   :  { %s198_s19 = smov 32   ;;  %s199_s20 = smov 2  }
  0x12   :  { %21 = dma.hbm_to_vmem [thread:$0]  %s267_s0, 64, %s16_s10, [#allocation3], %s198_s19, %s198_s19, %s199_s20  }
  0x13   :  { %s200_s23 = smov [#allocation5]   ;;  %s147_s27 = scalar_lea.hbm %s268_s1, 256 }
  0x14   :  { %s27_s24 = sshll.u32 %s200_s23, 4  ;;  %p148_p8 = scmp.ne.s32.totalorder %s268_s1, %s147_s27  ;;  %s28_s24 = int_to_ptr.vmem [resolvable:$true] %s27_s24 }
  0x15   :  { %p151_p9 = scmp.lt.u32.totalorder %s147_s27, %s268_s1 }
  0x17   :  { %p153_p10 = pnand %p151_p9, %p148_p8 }
  0x19   :  { %156 = shalt.err (!%p153_p10)
}
  0x1a   :  { %s157_s4 = scalar_lea.vmem %s28_s24, 256  ;;  %p162_p12 = scmp.lt.s32.totalorder %s28_s24, %s28_s24 }
  0x1b   :  { %p158_p11 = scmp.ne.s32.totalorder %s28_s24, %s157_s4  ;;  %p163_p13 = scmp.lt.s32.totalorder %s157_s4, %s157_s4 }
  0x1d   :  { %p164_p0 = por %p163_p13, %p162_p12 }
  0x1f   :  { %p165_p1 = pnand %p164_p0, %p158_p11 }
  0x21   :  { %168 = shalt.err (!%p165_p1)
}
  0x22   :  { %s201_s0 = smov 128   ;;  %s202_s5 = smov 8  }
  0x23   :  { %33 = dma.hbm_to_vmem [thread:$0]  %s268_s1, 256, %s28_s24, [#allocation6], %s201_s0, %s201_s0, %s202_s5  }
  0x24   :  { %191 = dma.done.wait [#allocation3], 64  }
  0x25   :  { %192 = vsyncadd [#allocation3], 4294967232 }
  0x26   :  { %193 = dma.done.wait [#allocation6], 256  }
  0x27   :  { %194 = vsyncadd [#allocation6], 4294967040  ;;  %vm42_vm0 = vcmask 261120   ;;  %v40_v0 = vld [vmem:[#allocation5] sm:$0xff]  ;;  %v41_v1 = vld [vmem:[#allocation5 + $0x8] sm:$0xff]  ;;  %v74_v16 = vlaneseq  ;;  %s203_s1 = smov [#allocation7]  }
  0x28   :  { %v43_v2 = vsel %vm42_vm0, %v40_v0, 0.0  ;;  %v46_v3 = vsel %vm42_vm0, %v41_v1, 0.0  ;;  %v70_v22 = vld [vmem:[#allocation2] sm:$0x3]  ;;  %v71_v25 = vld [vmem:[#allocation2 + $0x2] sm:$0x3] }
  0x29   :  { %44 = vadd.xlane.f32.xlu0 %v43_v2  ;;  %v75_v20 = vshrl.u32 %v74_v16, 7  ;;  %v72_v23 = vadd.f32 1.0, %v70_v22  ;;  %v73_v27 = vadd.f32 1.0, %v71_v25  ;;  %s101_s8 = sshll.u32 %s203_s1, 4  ;;  %s102_s8 = int_to_ptr.vmem [resolvable:$true] %s101_s8 }
  0x2a   :  { %s169_s9 = scalar_lea.vmem %s102_s8, 256  ;;  %p174_p3 = scmp.lt.s32.totalorder %s102_s8, %s102_s8 }
  0x2b   :  { %v76_v24 = vsub.s32 0, %v75_v20  ;;  %v86_v26 = vsub.s32 1, %v75_v20  ;;  %p170_p2 = scmp.ne.s32.totalorder %s102_s8, %s169_s9  ;;  %p175_p4 = scmp.lt.s32.totalorder %s169_s9, %s169_s9 }
  0x2d   :  { %47 = vadd.xlane.f32.xlu0 %v46_v3  ;;  %v77_v28 = vrot.slane %v72_v23, %v76_v24  ;;  %v87_v31 = vrot.slane %v70_v22, %v86_v26  ;;  %v81_v32 = vrot.slane %v73_v27, %v76_v24  ;;  %v91_v36 = vrot.slane %v71_v25, %v86_v26  ;;  %p176_p5 = por %p175_p4, %p174_p3 }
  0x2f   :  { %p177_p6 = pnand %p176_p5, %p170_p2 }
  0xb6   :  { %v45_v4 = vpop.xlane.xlu0 %44 }
  0xb7   :  { %v50_v5 = vmul.f32 0.03125, %v45_v4 }
  0xb9   :  { %v52_v6 = vsub.f32 %v40_v0, %v50_v5 }
  0xba   :  { %v48_v7 = vpop.xlane.xlu0 %47 }
  0xbb   :  { %v51_v8 = vmul.f32 0.03125, %v48_v7  ;;  %v54_v9 = vmul.f32 %v52_v6, %v52_v6 }
  0xbd   :  { %v53_v10 = vsub.f32 %v41_v1, %v51_v8  ;;  %v56_v11 = vsel %vm42_vm0, %v54_v9, 0.0 }
  0xbe   :  { %57 = vadd.xlane.f32.xlu1 %v56_v11 }
  0xbf   :  { %v55_v12 = vmul.f32 %v53_v10, %v53_v10 }
  0xc1   :  { %v59_v13 = vsel %vm42_vm0, %v55_v12, 0.0 }
  0xc2   :  { %60 = vadd.xlane.f32.xlu1 %v59_v13 }
 0x14b   :  { %v58_v14 = vpop.xlane.xlu1 %57 }
 0x14c   :  { %v62_v15 = vmul.f32 0.03125, %v58_v14 }
 0x14e   :  { %v64_v17 = vadd.f32 1e-06, %v62_v15 }
 0x14f   :  { %v61_v18 = vpop.xlane.xlu1 %60 }
 0x150   :  { %121 = vrsqrt.f32 %v64_v17  ;;  %v63_v19 = vmul.f32 0.03125, %v61_v18 }
 0x152   :  { %v65_v21 = vadd.f32 1e-06, %v63_v19 }
 0x154   :  { %123 = vrsqrt.f32 %v65_v21 }
 0x15a   :  { %v122_v29 = vpop.eup %121 }
 0x15b   :  { %v68_v30 = vmul.f32 %v122_v29, %v52_v6 }
 0x15d   :  { %v82_v33 = vmul.f32 %v77_v28, %v68_v30 }
 0x15e   :  { %v124_v34 = vpop.eup %123 }
 0x15f   :  { %v69_v35 = vmul.f32 %v124_v34, %v53_v10  ;;  %v92_v37 = vadd.f32 %v87_v31, %v82_v33 }
 0x161   :  { %v83_v38 = vmul.f32 %v81_v32, %v69_v35  ;;  %94 = vst.msk [vmem:[#allocation7] sm:$0xff] %vm42_vm0, %v92_v37 }
 0x163   :  { %v93_v39 = vadd.f32 %v91_v36, %v83_v38 }
 0x165   :  { %95 = vst.msk [vmem:[#allocation7 + $0x8] sm:$0xff] %vm42_vm0, %v93_v39 }
 0x166   :  { %180 = shalt.err (!%p177_p6)
}
 0x167   :  { %s181_s12 = scalar_lea.hbm %s269_s2, 256 }
 0x168   :  { %p182_p7 = scmp.ne.s32.totalorder %s269_s2, %s181_s12  ;;  %p185_p8 = scmp.lt.u32.totalorder %s181_s12, %s269_s2 }
 0x16a   :  { %p187_p9 = pnand %p185_p8, %p182_p7 }
 0x16c   :  { %190 = shalt.err (!%p187_p9)
}
 0x16d   :  { %107 = dma.vmem_to_hbm [thread:$0]  %s102_s8, 256, %s269_s2, [#allocation4], %s201_s0, %s201_s0, %s202_s5  }
 0x16e   :  { %195 = dma.done.wait [#allocation4], 256  }
 0x16f   :  { %196 = vsyncadd [#allocation4], 4294967040 }
 0x170   :  { %111 = vsyncpa [#allocation3], 1 }
 0x171   :  { %112 = vsyncpa [#allocation6], 1 }
 0x172   :  { %113 = vsyncpa [#allocation4], 1 }

</bundles_post_ra>
